<compile_context>
chip_gen: v7x
topology: tpu7x:2x2x1
jax: 0.10.0
libtpu: 0.0.40
codegen_flags: <defaults>
</compile_context>

<pallas_src>
import jax
import jax.numpy as jnp
from jax import lax
from jax.experimental import pallas as pl
from jax.experimental.pallas import tpu as pltpu

EPS = 1e-5
NEG_SLOPE = 0.01


def _matmul(a_bf16, w_bf16):
    """a: [B, K] bf16, w: [K, N] bf16 (pre-transposed) -> [B, N] f32 (MXU, f32 acc)."""
    return lax.dot_general(
        a_bf16,
        w_bf16,
        dimension_numbers=(((1,), (0,)), ((), ())),
        preferred_element_type=jnp.float32,
    )


def _bn_lrelu(h_f32):
    """BatchNorm1d (train-mode batch stats, gamma=1, beta=0) + LeakyReLU(0.01).

    Centered moments (non-negative variance, no cancellation NaNs). Stats and
    rsqrt in f32; result emitted in bf16 ready for the next MXU matmul.
    """
    mean = jnp.mean(h_f32, axis=0, keepdims=True)
    centered = h_f32 - mean
    var = jnp.mean(centered * centered, axis=0, keepdims=True)  # biased variance
    hn = centered * lax.rsqrt(var + EPS)
    # LeakyReLU as a single mul+max (cheaper than compare+select on the VPU).
    return jnp.maximum(hn, NEG_SLOPE * hn).astype(jnp.bfloat16)


def mimic_encoder_kernel(x_ref, w1_ref, w2_hbm, w3_hbm, out_ref,
                         w2_buf, w3_buf, sem):
    # Kick off layer-2/3 weight DMAs so they overlap with layer-1 compute.
    cp2 = pltpu.make_async_copy(w2_hbm, w2_buf, sem.at[0])
    cp3 = pltpu.make_async_copy(w3_hbm, w3_buf, sem.at[1])
    cp2.start()
    cp3.start()

    x = x_ref[...].astype(jnp.bfloat16)
    # fc_reduce: Linear(no bias) -> BN1d -> LeakyReLU
    g = _bn_lrelu(_matmul(x, w1_ref[...]))

    cp2.wait()
    # fc_aspp: Linear(no bias) -> BN1d -> LeakyReLU
    a = _bn_lrelu(_matmul(g, w2_buf[...]))

    cp3.wait()
    # fc_out: Linear(no bias)
    out_ref[...] = _matmul(a, w3_buf[...]).astype(out_ref.dtype)


def prepare_weights(w1, w2, w3):
    """One-time parameter prep (NOT per call): PyTorch-layout [out, in] f32 ->
    MXU-friendly [in, out] bf16."""
    prep = lambda w: jnp.asarray(w.T, dtype=jnp.bfloat16)
    return prep(w1), prep(w2), prep(w3)


def mimic_encoder(x, w1_t, w2_t, w3_t):
    """x: [B, input_dim] f32; w*_t are pre-transposed bf16 [in_features, out_features]."""
    B, input_dim = x.shape
    hidden_dim = w1_t.shape[1]
    output_dim = w3_t.shape[1]

    # Advisory cost so XLA schedules this as the tiny op it is.
    flops = 2 * B * (input_dim * hidden_dim + hidden_dim * hidden_dim
                     + hidden_dim * output_dim)
    bytes_accessed = (4 * x.size                                   # f32 input
                      + 2 * (w1_t.size + w2_t.size + w3_t.size)    # bf16 weights
                      + 4 * B * output_dim)                        # f32 output
    cost = pl.CostEstimate(flops=flops,
                           transcendentals=2 * hidden_dim,  # rsqrt per BN feature
                           bytes_accessed=bytes_accessed)

    full = lambda a: pl.BlockSpec(a.shape, lambda: (0,) * a.ndim)
    return pl.pallas_call(
        mimic_encoder_kernel,
        out_shape=jax.ShapeDtypeStruct((B, output_dim), jnp.float32),
        grid=(),
        in_specs=[full(x),                            # x -> VMEM up front
                  full(w1_t),                         # w1 -> VMEM up front (needed first)
                  pl.BlockSpec(memory_space=pl.ANY),  # w2 stays in HBM, manual DMA
                  pl.BlockSpec(memory_space=pl.ANY)], # w3 stays in HBM, manual DMA
        out_specs=pl.BlockSpec((B, output_dim), lambda: (0, 0)),
        scratch_shapes=[pltpu.VMEM(w2_t.shape, jnp.bfloat16),
                        pltpu.VMEM(w3_t.shape, jnp.bfloat16),
                        pltpu.SemaphoreType.DMA((2,))],
        cost_estimate=cost,
        # Footprint is ~160 KiB; default scoped-VMEM limit is plenty on
        # v5e/v6e/v7x at these shapes, so no vmem_limit_bytes override.
    )(x, w1_t, w2_t, w3_t)


# --- references --------------------------------------------------------------

def _bn_lrelu_ref(h):
    mean = jnp.mean(h, axis=0, keepdims=True)
    var = jnp.mean((h - mean) ** 2, axis=0, keepdims=True)
    hn = (h - mean) * lax.rsqrt(var + EPS)
    return jnp.where(hn >= 0, hn, NEG_SLOPE * hn)


def mimic_encoder_ref_f32(x, w1, w2, w3):
    """Pure f32 reference matching the PyTorch module's train-mode forward.
    Weights in PyTorch layout [out, in]."""
    g = _bn_lrelu_ref(x @ w1.T)
    a = _bn_lrelu_ref(g @ w2.T)
    return a @ w3.T


def mimic_encoder_ref_matched(x, w1_t, w2_t, w3_t):
    """Reference mirroring the kernel's exact math (bf16 weights/activations, f32 BN)."""
    g = _bn_lrelu(_matmul(x.astype(jnp.bfloat16), w1_t))
    a = _bn_lrelu(_matmul(g, w2_t))
    return _matmul(a, w3_t)


def kaiming_normal_fan_out(key, out_features, in_features):
    # nn.init.kaiming_normal_(w, mode='fan_out'): std = sqrt(2 / fan_out)
    std = (2.0 / out_features) ** 0.5
    return std * jax.random.normal(key, (out_features, in_features), jnp.float32)


if __name__ == "__main__":
    B, input_dim, hidden_dim, output_dim = 8, 128, 128, 128

    key = jax.random.PRNGKey(0)
    kx, k1, k2, k3 = jax.random.split(key, 4)
    x = jax.random.normal(kx, (B, input_dim), jnp.float32)
    w1 = kaiming_normal_fan_out(k1, hidden_dim, input_dim)   # fc_reduce Linear
    w2 = kaiming_normal_fan_out(k2, hidden_dim, hidden_dim)  # fc_aspp Linear
    w3 = kaiming_normal_fan_out(k3, output_dim, hidden_dim)  # fc_out Linear

    # One-time parameter prep (transpose + bf16 cast), not per call.
    w1_t, w2_t, w3_t = prepare_weights(w1, w2, w3)

    out = mimic_encoder(x, w1_t, w2_t, w3_t)
    out = jax.block_until_ready(out)
    assert out.shape == (B, output_dim)

    # Apples-to-apples: same math (bf16 MXU, f32 BN) in plain JAX.
    ref_matched = mimic_encoder_ref_matched(x, w1_t, w2_t, w3_t)
    assert jnp.allclose(out, ref_matched, atol=2e-3, rtol=2e-3), \
        "mismatch vs bf16-matched reference"

    # Semantics sanity vs full-f32 PyTorch-style reference (bf16 rounding slack).
    ref_f32 = mimic_encoder_ref_f32(x, w1, w2, w3)
    assert jnp.allclose(out, ref_f32, atol=5e-2, rtol=5e-2), \
        "mismatch vs f32 reference"

    print("KERNEL_OK")
</pallas_src>

<mosaic_0001>
module attributes {stable_mosaic.version = 11 : i64} {
  func.func @mimic_encoder_kernel(%arg0: memref<8x128xf32, #tpu.memory_space<vmem>>, %arg1: memref<128x128xbf16, #tpu.memory_space<vmem>>, %arg2: memref<128x128xbf16, #tpu.memory_space<any>>, %arg3: memref<128x128xbf16, #tpu.memory_space<any>>, %arg4: memref<8x128xf32, #tpu.memory_space<vmem>>, %arg5: memref<128x128xbf16, #tpu.memory_space<vmem>>, %arg6: memref<128x128xbf16, #tpu.memory_space<vmem>>, %arg7: memref<2x!tpu.dma_semaphore, #tpu.memory_space<semaphore_mem>>) attributes {dimension_semantics = [], scalar_prefetch = 0 : i64, scratch_operands = 3 : i64, tpu.core_type = #tpu.core_type<tc>} {
    %c0_i32 = arith.constant 0 : i32
    %0 = tpu.memref_slice %arg7[%c0_i32] : memref<2x!tpu.dma_semaphore, #tpu.memory_space<semaphore_mem>> -> memref<1x!tpu.dma_semaphore, #tpu.memory_space<semaphore_mem>>
    %1 = tpu.memref_squeeze %0 : memref<1x!tpu.dma_semaphore, #tpu.memory_space<semaphore_mem>> -> memref<!tpu.dma_semaphore, #tpu.memory_space<semaphore_mem>>
    tpu.enqueue_dma source(%arg2 : memref<128x128xbf16, #tpu.memory_space<any>>) target(%arg5 : memref<128x128xbf16, #tpu.memory_space<vmem>>) target_semaphore(%1 : memref<!tpu.dma_semaphore, #tpu.memory_space<semaphore_mem>>)
    %c1_i32 = arith.constant 1 : i32
    %2 = tpu.memref_slice %arg7[%c1_i32] : memref<2x!tpu.dma_semaphore, #tpu.memory_space<semaphore_mem>> -> memref<1x!tpu.dma_semaphore, #tpu.memory_space<semaphore_mem>>
    %3 = tpu.memref_squeeze %2 : memref<1x!tpu.dma_semaphore, #tpu.memory_space<semaphore_mem>> -> memref<!tpu.dma_semaphore, #tpu.memory_space<semaphore_mem>>
    tpu.enqueue_dma source(%arg3 : memref<128x128xbf16, #tpu.memory_space<any>>) target(%arg6 : memref<128x128xbf16, #tpu.memory_space<vmem>>) target_semaphore(%3 : memref<!tpu.dma_semaphore, #tpu.memory_space<semaphore_mem>>)
    %c0 = arith.constant 0 : index
    %c0_0 = arith.constant 0 : index
    %4 = vector.load %arg0[%c0, %c0_0] : memref<8x128xf32, #tpu.memory_space<vmem>>, vector<8x128xf32>
    %5 = arith.truncf %4 : vector<8x128xf32> to vector<8x128xbf16>
    %c0_1 = arith.constant 0 : index
    %c0_2 = arith.constant 0 : index
    %6 = vector.load %arg1[%c0_1, %c0_2] : memref<128x128xbf16, #tpu.memory_space<vmem>>, vector<128x128xbf16>
    %cst = arith.constant dense<0.000000e+00> : vector<8x128xf32>
    %7 = tpu.matmul %5, %6, %cst {dimension_numbers = #tpu.dot_dimension_numbers<[1], [0], [0], [1], [0, 0, 1, 1], [], []>} : vector<8x128xbf16>, vector<128x128xbf16>, vector<8x128xf32> -> vector<8x128xf32>
    %cst_3 = arith.constant dense<0.000000e+00> : vector<128xf32>
    %8 = vector.multi_reduction <add>, %7, %cst_3 [0] : vector<8x128xf32> to vector<128xf32>
    %9 = vector.shape_cast %8 : vector<128xf32> to vector<1x128xf32>
    %cst_4 = arith.constant 8.000000e+00 : f32
    %10 = vector.broadcast %cst_4 : f32 to vector<1x128xf32>
    %11 = arith.divf %9, %10 : vector<1x128xf32>
    %12 = vector.broadcast %11 : vector<1x128xf32> to vector<8x128xf32>
    %13 = arith.subf %7, %12 : vector<8x128xf32>
    %14 = arith.mulf %13, %13 : vector<8x128xf32>
    %cst_5 = arith.constant dense<0.000000e+00> : vector<128xf32>
    %15 = vector.multi_reduction <add>, %14, %cst_5 [0] : vector<8x128xf32> to vector<128xf32>
    %16 = vector.shape_cast %15 : vector<128xf32> to vector<1x128xf32>
    %cst_6 = arith.constant 8.000000e+00 : f32
    %17 = vector.broadcast %cst_6 : f32 to vector<1x128xf32>
    %18 = arith.divf %16, %17 : vector<1x128xf32>
    %cst_7 = arith.constant 9.99999974E-6 : f32
    %19 = vector.broadcast %cst_7 : f32 to vector<1x128xf32>
    %20 = arith.addf %18, %19 : vector<1x128xf32>
    %21 = math.rsqrt %20 : vector<1x128xf32>
    %22 = vector.broadcast %21 : vector<1x128xf32> to vector<8x128xf32>
    %23 = arith.mulf %13, %22 : vector<8x128xf32>
    %cst_8 = arith.constant 0.00999999977 : f32
    %24 = vector.broadcast %cst_8 : f32 to vector<8x128xf32>
    %25 = arith.mulf %24, %23 : vector<8x128xf32>
    %26 = arith.maximumf %23, %25 : vector<8x128xf32>
    %27 = arith.truncf %26 : vector<8x128xf32> to vector<8x128xbf16>
    %c0_i32_9 = arith.constant 0 : i32
    %28 = tpu.memref_slice %arg7[%c0_i32_9] : memref<2x!tpu.dma_semaphore, #tpu.memory_space<semaphore_mem>> -> memref<1x!tpu.dma_semaphore, #tpu.memory_space<semaphore_mem>>
    %29 = tpu.memref_squeeze %28 : memref<1x!tpu.dma_semaphore, #tpu.memory_space<semaphore_mem>> -> memref<!tpu.dma_semaphore, #tpu.memory_space<semaphore_mem>>
    tpu.wait_dma2 semaphore(%29 : memref<!tpu.dma_semaphore, #tpu.memory_space<semaphore_mem>>) src(%arg2 : memref<128x128xbf16, #tpu.memory_space<any>>) dst(%arg5 : memref<128x128xbf16, #tpu.memory_space<vmem>>)
    %c0_10 = arith.constant 0 : index
    %c0_11 = arith.constant 0 : index
    %30 = vector.load %arg5[%c0_10, %c0_11] : memref<128x128xbf16, #tpu.memory_space<vmem>>, vector<128x128xbf16>
    %cst_12 = arith.constant dense<0.000000e+00> : vector<8x128xf32>
    %31 = tpu.matmul %27, %30, %cst_12 {dimension_numbers = #tpu.dot_dimension_numbers<[1], [0], [0], [1], [0, 0, 1, 1], [], []>} : vector<8x128xbf16>, vector<128x128xbf16>, vector<8x128xf32> -> vector<8x128xf32>
    %cst_13 = arith.constant dense<0.000000e+00> : vector<128xf32>
    %32 = vector.multi_reduction <add>, %31, %cst_13 [0] : vector<8x128xf32> to vector<128xf32>
    %33 = vector.shape_cast %32 : vector<128xf32> to vector<1x128xf32>
    %cst_14 = arith.constant 8.000000e+00 : f32
    %34 = vector.broadcast %cst_14 : f32 to vector<1x128xf32>
    %35 = arith.divf %33, %34 : vector<1x128xf32>
    %36 = vector.broadcast %35 : vector<1x128xf32> to vector<8x128xf32>
    %37 = arith.subf %31, %36 : vector<8x128xf32>
    %38 = arith.mulf %37, %37 : vector<8x128xf32>
    %cst_15 = arith.constant dense<0.000000e+00> : vector<128xf32>
    %39 = vector.multi_reduction <add>, %38, %cst_15 [0] : vector<8x128xf32> to vector<128xf32>
    %40 = vector.shape_cast %39 : vector<128xf32> to vector<1x128xf32>
    %cst_16 = arith.constant 8.000000e+00 : f32
    %41 = vector.broadcast %cst_16 : f32 to vector<1x128xf32>
    %42 = arith.divf %40, %41 : vector<1x128xf32>
    %cst_17 = arith.constant 9.99999974E-6 : f32
    %43 = vector.broadcast %cst_17 : f32 to vector<1x128xf32>
    %44 = arith.addf %42, %43 : vector<1x128xf32>
    %45 = math.rsqrt %44 : vector<1x128xf32>
    %46 = vector.broadcast %45 : vector<1x128xf32> to vector<8x128xf32>
    %47 = arith.mulf %37, %46 : vector<8x128xf32>
    %cst_18 = arith.constant 0.00999999977 : f32
    %48 = vector.broadcast %cst_18 : f32 to vector<8x128xf32>
    %49 = arith.mulf %48, %47 : vector<8x128xf32>
    %50 = arith.maximumf %47, %49 : vector<8x128xf32>
    %51 = arith.truncf %50 : vector<8x128xf32> to vector<8x128xbf16>
    %c1_i32_19 = arith.constant 1 : i32
    %52 = tpu.memref_slice %arg7[%c1_i32_19] : memref<2x!tpu.dma_semaphore, #tpu.memory_space<semaphore_mem>> -> memref<1x!tpu.dma_semaphore, #tpu.memory_space<semaphore_mem>>
    %53 = tpu.memref_squeeze %52 : memref<1x!tpu.dma_semaphore, #tpu.memory_space<semaphore_mem>> -> memref<!tpu.dma_semaphore, #tpu.memory_space<semaphore_mem>>
    tpu.wait_dma2 semaphore(%53 : memref<!tpu.dma_semaphore, #tpu.memory_space<semaphore_mem>>) src(%arg3 : memref<128x128xbf16, #tpu.memory_space<any>>) dst(%arg6 : memref<128x128xbf16, #tpu.memory_space<vmem>>)
    %c0_20 = arith.constant 0 : index
    %c0_21 = arith.constant 0 : index
    %54 = vector.load %arg6[%c0_20, %c0_21] : memref<128x128xbf16, #tpu.memory_space<vmem>>, vector<128x128xbf16>
    %cst_22 = arith.constant dense<0.000000e+00> : vector<8x128xf32>
    %55 = tpu.matmul %51, %54, %cst_22 {dimension_numbers = #tpu.dot_dimension_numbers<[1], [0], [0], [1], [0, 0, 1, 1], [], []>} : vector<8x128xbf16>, vector<128x128xbf16>, vector<8x128xf32> -> vector<8x128xf32>
    %c0_23 = arith.constant 0 : index
    %c0_24 = arith.constant 0 : index
    %56 = vector.load %arg4[%c0_23, %c0_24] : memref<8x128xf32, #tpu.memory_space<vmem>>, vector<8x128xf32>
    tpu.vector_store %arg4[%c0_23, %c0_24], %55 {strides = array<i32>} : memref<8x128xf32, #tpu.memory_space<vmem>>, vector<8x128xf32>,
    return
  }
}

</mosaic_0001>

<bundles_post_ra>
// kernel: tpu_custom_call.1
= control target key start
LH: loop header
LB: loop body
LE: loop exit
PB: predicated region body
PF: predicated region fallthrough
CT: control target
= control target key end

     0   :  { %9 = vsyncpa [#allocation6], 0  ;;  %s716_s0 = inlined_call_operand.hbm [shape: f32[8,128], index: 0, kind: input, shape index: {}]   ;;  %s717_s1 = inlined_call_operand.hbm [shape: bf16[128,128], index: 1, kind: input, shape index: {}]   ;;  %s718_s2 = inlined_call_operand.hbm [shape: bf16[128,128], index: 2, kind: input, shape index: {}]   ;;  %s719_s3 = inlined_call_operand.hbm [shape: bf16[128,128], index: 3, kind: input, shape index: {}]   ;;  %s720_s4 = inlined_call_operand.hbm [shape: f32[8,128], index: 4, kind: output, shape index: {}]  }
   0x1   :  { %10 = vsyncpa [#allocation9], 0 }
   0x2   :  { %11 = vsyncpa [#allocation7], 0  ;;  %s585_s15 = smov [#allocation5]   ;;  %s586_s17 = smov [#allocation8]  }
   0x3   :  { %s18_s16 = sshll.u32 %s585_s15, 4  ;;  %s27_s18 = sshll.u32 %s586_s17, 4  ;;  %s19_s16 = int_to_ptr.vmem [resolvable:$true] %s18_s16  ;;  %s619_s18 = int_to_ptr.vmem [resolvable:$true] %s27_s18 }
   0x4   :  { %s465_s21 = scalar_lea.hbm %s716_s0, 128 }
   0x5   :  { %p466_p0 = scmp.ne.s32.totalorder %s716_s0, %s465_s21  ;;  %p469_p1 = scmp.lt.u32.totalorder %s465_s21, %s716_s0 }
   0x7   :  { %p471_p2 = pnand %p469_p1, %p466_p0 }
   0x9   :  { %474 = shalt.err (!%p471_p2)
}
   0xa   :  { %s475_s26 = scalar_lea.vmem %s19_s16, 128  ;;  %p480_p4 = scmp.lt.s32.totalorder %s19_s16, %s19_s16 }
   0xb   :  { %p476_p3 = scmp.ne.s32.totalorder %s19_s16, %s475_s26  ;;  %p481_p5 = scmp.lt.s32.totalorder %s475_s26, %s475_s26 }
   0xd   :  { %p482_p6 = por %p481_p5, %p480_p4 }
   0xf   :  { %p483_p7 = pnand %p482_p6, %p476_p3 }
  0x11   :  { %486 = shalt.err (!%p483_p7)
}
  0x12   :  { %21 = dma.hbm_to_vmem [thread:$0]  %s716_s0, 128, %s19_s16, [#allocation6]  }
  0x13   :  { %s487_s5 = scalar_lea.hbm %s717_s1, 1024 }
  0x14   :  { %p488_p8 = scmp.ne.s32.totalorder %s717_s1, %s487_s5  ;;  %p491_p9 = scmp.lt.u32.totalorder %s487_s5, %s717_s1 }
  0x16   :  { %p493_p10 = pnand %p491_p9, %p488_p8 }
  0x18   :  { %496 = shalt.err (!%p493_p10)
}
  0x19   :  { %s497_s10 = scalar_lea.vmem %s619_s18, 1024  ;;  %p502_p12 = scmp.lt.s32.totalorder %s619_s18, %s619_s18 }
  0x1a   :  { %p498_p11 = scmp.ne.s32.totalorder %s619_s18, %s497_s10  ;;  %p503_p13 = scmp.lt.s32.totalorder %s497_s10, %s497_s10 }
  0x1c   :  { %p504_p0 = por %p503_p13, %p502_p12 }
  0x1e   :  { %p505_p1 = pnand %p504_p0, %p498_p11 }
  0x20   :  { %508 = shalt.err (!%p505_p1)
}
  0x21   :  { %s587_s0 = smov 64   ;;  %s588_s11 = smov 4  }
  0x22   :  { %33 = dma.hbm_to_vmem [thread:$0]  %s717_s1, 1024, %s619_s18, [#allocation9], %s587_s0, %s587_s0, %s588_s11  }
  0x23   :  { %575 = dma.done.wait [#allocation6], 128  }
  0x24   :  { %576 = vsyncadd [#allocation6], 4294967168 }
  0x25   :  { %577 = dma.done.wait [#allocation9], 1024  }
  0x26   :  { %578 = vsyncadd [#allocation9], 4294966272  ;;  %v589_v0 = vmov 0.0   ;;  %vm590_vm0 = vmmov 0   ;;  %v453_v1 = vld [vmem:[#allocation8] sm:$0xff]   ;;  %v454_v2 = vld [vmem:[#allocation8 + $0x8] sm:$0xff]  }
  0x27   :  { %384 = vmatprep.subr.bf16.mxu0 %v589_v0  ;;  %400 = vmatprep.mubr.msk.bf16.mxu0 %vm590_vm0, %v589_v0  ;;  %v455_v3 = vld [vmem:[#allocation8 + $0x10] sm:$0xff]   ;;  %v456_v4 = vld [vmem:[#allocation8 + $0x18] sm:$0xff]   ;;  %v457_v5 = vld [vmem:[#allocation8 + $0x20] sm:$0xff]   ;;  %s591_s1 = smov [#allocation2]   ;;  %s592_s15 = smov [#allocation3]  }
  0x28   :  { %385 = vmatpush3.bf16.msra.mxu0 %v453_v1  ;;  %v458_v6 = vld [vmem:[#allocation8 + $0x28] sm:$0xff]   ;;  %v459_v7 = vld [vmem:[#allocation8 + $0x30] sm:$0xff]   ;;  %v460_v8 = vld [vmem:[#allocation8 + $0x38] sm:$0xff]   ;;  %s48_s14 = sshll.u32 %s591_s1, 4  ;;  %s60_s16 = sshll.u32 %s592_s15, 4  ;;  %s49_s14 = int_to_ptr.vmem [resolvable:$true] %s48_s14  ;;  %s61_s16 = int_to_ptr.vmem [resolvable:$true] %s60_s16 }
  0x29   :  { %386 = vmatprep.subr.bf16.mxu0 %v589_v0  ;;  %v64_v9 = vld [vmem:[#allocation5] sm:$0xff]  ;;  %s509_s19 = scalar_lea.hbm %s718_s2, 1024 }
  0x2a   :  { %v65_v10 = vpack.c.bf16 %v64_v9, %v64_v9  ;;  %p510_p2 = scmp.ne.s32.totalorder %s718_s2, %s509_s19  ;;  %p513_p3 = scmp.lt.u32.totalorder %s509_s19, %s718_s2 }
  0x2c   :  { %387 = vmatpush3.bf16.msra.mxu0 %v454_v2  ;;  %p515_p4 = pnand %p513_p3, %p510_p2 }
  0x2d   :  { %388 = vmatprep.subr.bf16.mxu0 %v589_v0 }
  0x30   :  { %389 = vmatpush3.bf16.msra.mxu0 %v455_v3 }
  0x31   :  { %390 = vmatprep.subr.bf16.mxu0 %v589_v0 }
  0x34   :  { %391 = vmatpush3.bf16.msra.mxu0 %v456_v4 }
  0x35   :  { %392 = vmatprep.subr.bf16.mxu0 %v589_v0 }
  0x38   :  { %393 = vmatpush3.bf16.msra.mxu0 %v457_v5 }
  0x39   :  { %394 = vmatprep.subr.bf16.mxu0 %v589_v0 }
  0x3c   :  { %395 = vmatpush3.bf16.msra.mxu0 %v458_v6 }
  0x3d   :  { %396 = vmatprep.subr.bf16.mxu0 %v589_v0 }
  0x40   :  { %397 = vmatpush3.bf16.msra.mxu0 %v459_v7 }
  0x41   :  { %398 = vmatprep.subr.bf16.mxu0 %v589_v0 }
  0x44   :  { %399 = vmatpush3.bf16.msra.mxu0 %v460_v8 }
  0x47   :  { %401 = vmatmul.mubr.bf16.vlgmr.msra.gmra.mrb[0].mxu0 %v65_v10 }
  0x48   :  { %518 = shalt.err (!%p515_p4)  }
  0x49   :  { %s519_s24 = scalar_lea.vmem %s49_s14, 1024  ;;  %p524_p6 = scmp.lt.s32.totalorder %s49_s14, %s49_s14 }
  0x4a   :  { %p520_p5 = scmp.ne.s32.totalorder %s49_s14, %s519_s24  ;;  %p525_p7 = scmp.lt.s32.totalorder %s519_s24, %s519_s24 }
  0x4c   :  { %p526_p8 = por %p525_p7, %p524_p6 }
  0x4e   :  { %p527_p9 = pnand %p526_p8, %p520_p5 }
  0x50   :  { %530 = shalt.err (!%p527_p9)  }
  0x51   :  { %51 = dma.hbm_to_vmem [thread:$0]  %s718_s2, 1024, %s49_s14, [#allocation4] }
  0x52   :  { %s531_s29 = scalar_lea.hbm %s719_s3, 1024 }
  0x53   :  { %p532_p10 = scmp.ne.s32.totalorder %s719_s3, %s531_s29  ;;  %p535_p11 = scmp.lt.u32.totalorder %s531_s29, %s719_s3 }
  0x55   :  { %p537_p12 = pnand %p535_p11, %p532_p10 }
  0x57   :  { %540 = shalt.err (!%p537_p12)  }
  0x58   :  { %s541_s8 = scalar_lea.vmem %s61_s16, 1024  ;;  %p546_p0 = scmp.lt.s32.totalorder %s61_s16, %s61_s16 }
  0x59   :  { %p542_p13 = scmp.ne.s32.totalorder %s61_s16, %s541_s8  ;;  %p547_p1 = scmp.lt.s32.totalorder %s541_s8, %s541_s8 }
  0x5b   :  { %p548_p2 = por %p547_p1, %p546_p0 }
  0x5d   :  { %p549_p3 = pnand %p548_p2, %p542_p13 }
  0x5f   :  { %552 = shalt.err (!%p549_p3)  }
  0x60   :  { %63 = dma.hbm_to_vmem [thread:$0]  %s719_s3, 1024, %s61_s16, [#allocation4 + $0x1] }
 0x11a   :  { %v164_v11 = vpop.f32.mrb[0].mxu0 }
 0x11b   :  { %v170_v12 = vrot.slane %v164_v11, 4  ;;  %v402_v13 = vpop.f32.mrb[1].mxu0 }
 0x11c   :  { %v167_v14 = vpop.f32.mrb[2].mxu0 }
 0x11d   :  { %v171_v15 = vadd.f32 %v170_v12, %v164_v11  ;;  %v403_v16 = vpop.f32.mrb[3].mxu0 }
 0x11f   :  { %v172_v17 = vrot.slane %v171_v15, 2 }
 0x121   :  { %v173_v18 = vadd.f32 %v172_v17, %v171_v15 }
 0x123   :  { %v174_v19 = vrot.slane %v173_v18, 1 }
 0x125   :  { %v175_v20 = vadd.f32 %v174_v19, %v173_v18 }
 0x127   :  { %v177_v21 = vmul.f32 0.125, %v175_v20 }
 0x129   :  { %v178_v22 = vsub.f32 %v164_v11, %v177_v21 }
 0x12b   :  { %v179_v23 = vmul.f32 %v178_v22, %v178_v22 }
 0x12d   :  { %v180_v24 = vrot.slane %v179_v23, 4 }
 0x12f   :  { %v181_v25 = vadd.f32 %v180_v24, %v179_v23 }
 0x131   :  { %v182_v26 = vrot.slane %v181_v25, 2 }
 0x133   :  { %v183_v27 = vadd.f32 %v182_v26, %v181_v25 }
 0x135   :  { %v184_v28 = vrot.slane %v183_v27, 1 }
 0x137   :  { %v185_v29 = vadd.f32 %v184_v28, %v183_v27 }
 0x139   :  { %v186_v30 = vmul.f32 0.125, %v185_v29 }
 0x13b   :  { %v187_v31 = vadd.f32 1e-05, %v186_v30 }
 0x13d   :  { %461 = vrsqrt.f32 %v187_v31 }
 0x147   :  { %v462_v32 = vpop.eup %461 }
 0x148   :  { %v189_v33 = vmul.f32 %v462_v32, %v178_v22 }
 0x14a   :  { %v190_v34 = vmul.f32 0.01, %v189_v33 }
 0x14c   :  { %v191_v35 = vmax.f32 %v189_v33, %v190_v34 }
 0x14e   :  { %v192_v36 = vpack.c.bf16 %v191_v35, %v191_v35 }
 0x14f   :  { %579 = dma.done.wait [#allocation4], 1024 }
 0x150   :  { %580 = vsyncadd [#allocation4], 4294966272  ;;  %404 = vmatprep.subr.bf16.mxu1 %v589_v0  ;;  %420 = vmatprep.mubr.msk.bf16.mxu1 %vm590_vm0, %v589_v0  ;;  %v197_v37 = vld [vmem:[#allocation2] sm:$0xff]  ;;  %v198_v38 = vld [vmem:[#allocation2 + $0x8] sm:$0xff] }
 0x151   :  { %405 = vmatpush3.bf16.msra.mxu1 %v197_v37  ;;  %v199_v39 = vld [vmem:[#allocation2 + $0x10] sm:$0xff]  ;;  %v200_v40 = vld [vmem:[#allocation2 + $0x18] sm:$0xff]  ;;  %v201_v41 = vld [vmem:[#allocation2 + $0x20] sm:$0xff] }
 0x152   :  { %406 = vmatprep.subr.bf16.mxu1 %v589_v0  ;;  %v202_v42 = vld [vmem:[#allocation2 + $0x28] sm:$0xff]  ;;  %v203_v43 = vld [vmem:[#allocation2 + $0x30] sm:$0xff]  ;;  %v204_v44 = vld [vmem:[#allocation2 + $0x38] sm:$0xff] }
 0x155   :  { %407 = vmatpush3.bf16.msra.mxu1 %v198_v38 }
 0x156   :  { %408 = vmatprep.subr.bf16.mxu1 %v589_v0 }
 0x159   :  { %409 = vmatpush3.bf16.msra.mxu1 %v199_v39 }
 0x15a   :  { %410 = vmatprep.subr.bf16.mxu1 %v589_v0 }
 0x15d   :  { %411 = vmatpush3.bf16.msra.mxu1 %v200_v40 }
 0x15e   :  { %412 = vmatprep.subr.bf16.mxu1 %v589_v0 }
 0x161   :  { %413 = vmatpush3.bf16.msra.mxu1 %v201_v41 }
 0x162   :  { %414 = vmatprep.subr.bf16.mxu1 %v589_v0 }
 0x165   :  { %415 = vmatpush3.bf16.msra.mxu1 %v202_v42 }
 0x166   :  { %416 = vmatprep.subr.bf16.mxu1 %v589_v0 }
 0x169   :  { %417 = vmatpush3.bf16.msra.mxu1 %v203_v43 }
 0x16a   :  { %418 = vmatprep.subr.bf16.mxu1 %v589_v0 }
 0x16d   :  { %419 = vmatpush3.bf16.msra.mxu1 %v204_v44 }
 0x170   :  { %421 = vmatmul.mubr.bf16.vlgmr.msra.gmra.mrb[0].mxu1 %v192_v36 }
 0x243   :  { %v239_v45 = vpop.f32.mrb[0].mxu1 }
 0x244   :  { %v245_v46 = vrot.slane %v239_v45, 4  ;;  %v422_v47 = vpop.f32.mrb[1].mxu1 }
 0x245   :  { %v242_v48 = vpop.f32.mrb[2].mxu1 }
 0x246   :  { %v246_v49 = vadd.f32 %v245_v46, %v239_v45  ;;  %v423_v50 = vpop.f32.mrb[3].mxu1 }
 0x248   :  { %v247_v51 = vrot.slane %v246_v49, 2 }
 0x24a   :  { %v248_v52 = vadd.f32 %v247_v51, %v246_v49 }
 0x24c   :  { %v249_v53 = vrot.slane %v248_v52, 1 }
 0x24e   :  { %v250_v54 = vadd.f32 %v249_v53, %v248_v52 }
 0x250   :  { %v251_v55 = vmul.f32 0.125, %v250_v54 }
 0x252   :  { %v252_v56 = vsub.f32 %v239_v45, %v251_v55 }
 0x254   :  { %v253_v57 = vmul.f32 %v252_v56, %v252_v56 }
 0x256   :  { %v254_v58 = vrot.slane %v253_v57, 4 }
 0x258   :  { %v255_v59 = vadd.f32 %v254_v58, %v253_v57 }
 0x25a   :  { %v256_v60 = vrot.slane %v255_v59, 2 }
 0x25c   :  { %v257_v61 = vadd.f32 %v256_v60, %v255_v59 }
 0x25e   :  { %v258_v62 = vrot.slane %v257_v61, 1 }
 0x260   :  { %v259_v63 = vadd.f32 %v258_v62, %v257_v61 }
 0x262   :  { %v260_v1 = vmul.f32 0.125, %v259_v63 }
 0x264   :  { %v261_v2 = vadd.f32 1e-05, %v260_v1 }
 0x266   :  { %463 = vrsqrt.f32 %v261_v2 }
 0x270   :  { %v464_v3 = vpop.eup %463 }
 0x271   :  { %v263_v4 = vmul.f32 %v464_v3, %v252_v56 }
 0x273   :  { %v264_v5 = vmul.f32 0.01, %v263_v4 }
 0x275   :  { %v265_v6 = vmax.f32 %v263_v4, %v264_v5 }
 0x277   :  { %v266_v7 = vpack.c.bf16 %v265_v6, %v265_v6 }
 0x278   :  { %581 = dma.done.wait [#allocation4 + $0x1], 1024 }
 0x279   :  { %582 = vsyncadd [#allocation4 + $0x1], 4294966272  ;;  %424 = vmatprep.subr.bf16.mxu0 %v589_v0  ;;  %440 = vmatprep.mubr.msk.bf16.mxu0 %vm590_vm0, %v589_v0  ;;  %v269_v8 = vld [vmem:[#allocation3] sm:$0xff]  ;;  %v270_v9 = vld [vmem:[#allocation3 + $0x8] sm:$0xff]  ;;  %s593_s3 = smov [#allocation10]  }
 0x27a   :  { %425 = vmatpush3.bf16.msra.mxu0 %v269_v8  ;;  %v271_v10 = vld [vmem:[#allocation3 + $0x10] sm:$0xff]  ;;  %v272_v11 = vld [vmem:[#allocation3 + $0x18] sm:$0xff]  ;;  %v273_v12 = vld [vmem:[#allocation3 + $0x20] sm:$0xff]  ;;  %s324_s10 = sshll.u32 %s593_s3, 4  ;;  %s325_s10 = int_to_ptr.vmem [resolvable:$true] %s324_s10 }
 0x27b   :  { %426 = vmatprep.subr.bf16.mxu0 %v589_v0  ;;  %v274_v13 = vld [vmem:[#allocation3 + $0x28] sm:$0xff]  ;;  %v275_v14 = vld [vmem:[#allocation3 + $0x30] sm:$0xff]  ;;  %v276_v15 = vld [vmem:[#allocation3 + $0x38] sm:$0xff]  ;;  %s553_s0 = scalar_lea.vmem %s325_s10, 128  ;;  %p558_p5 = scmp.lt.s32.totalorder %s325_s10, %s325_s10 }
 0x27c   :  { %p554_p4 = scmp.ne.s32.totalorder %s325_s10, %s553_s0  ;;  %p559_p6 = scmp.lt.s32.totalorder %s553_s0, %s553_s0 }
 0x27e   :  { %427 = vmatpush3.bf16.msra.mxu0 %v270_v9  ;;  %p560_p7 = por %p559_p6, %p558_p5 }
 0x27f   :  { %428 = vmatprep.subr.bf16.mxu0 %v589_v0 }
 0x280   :  { %p561_p8 = pnand %p560_p7, %p554_p4 }
 0x282   :  { %429 = vmatpush3.bf16.msra.mxu0 %v271_v10 }
 0x283   :  { %430 = vmatprep.subr.bf16.mxu0 %v589_v0 }
 0x286   :  { %431 = vmatpush3.bf16.msra.mxu0 %v272_v11 }
 0x287   :  { %432 = vmatprep.subr.bf16.mxu0 %v589_v0 }
 0x28a   :  { %433 = vmatpush3.bf16.msra.mxu0 %v273_v12 }
 0x28b   :  { %434 = vmatprep.subr.bf16.mxu0 %v589_v0 }
 0x28e   :  { %435 = vmatpush3.bf16.msra.mxu0 %v274_v13 }
 0x28f   :  { %436 = vmatprep.subr.bf16.mxu0 %v589_v0 }
 0x292   :  { %437 = vmatpush3.bf16.msra.mxu0 %v275_v14 }
 0x293   :  { %438 = vmatprep.subr.bf16.mxu0 %v589_v0 }
 0x296   :  { %439 = vmatpush3.bf16.msra.mxu0 %v276_v15 }
 0x299   :  { %441 = vmatmul.mubr.bf16.vlgmr.msra.gmra.mrb[4].mxu0 %v266_v7 }
 0x36c   :  { %v311_v16 = vpop.f32.mrb[4].mxu0 }
 0x36d   :  { %317 = vst [vmem:[#allocation10] sm:$0xff] %v311_v16  ;;  %v442_v17 = vpop.f32.mrb[5].mxu0 }
 0x36e   :  { %v314_v18 = vpop.f32.mrb[6].mxu0 }
 0x36f   :  { %564 = shalt.err (!%p561_p8)
}
 0x370   :  { %s565_s13 = scalar_lea.hbm %s720_s4, 128 }
 0x371   :  { %p566_p9 = scmp.ne.s32.totalorder %s720_s4, %s565_s13  ;;  %p569_p10 = scmp.lt.u32.totalorder %s565_s13, %s720_s4 }
 0x373   :  { %p571_p11 = pnand %p569_p10, %p566_p9 }
 0x375   :  { %574 = shalt.err (!%p571_p11)
}
 0x376   :  { %327 = dma.vmem_to_hbm [thread:$0]  %s325_s10, 128, %s720_s4, [#allocation7]   ;;  %v443_v0 = vpop.f32.mrb[7].mxu0 }
 0x377   :  { %583 = dma.done.wait [#allocation7], 128  }
 0x378   :  { %584 = vsyncadd [#allocation7], 4294967168 }
 0x379   :  { %331 = vsyncpa [#allocation6], 1 }
 0x37a   :  { %332 = vsyncpa [#allocation9], 1 }
 0x37b   :  { %333 = vsyncpa [#allocation7], 1 }
 0x37c   :  { %334 = vsyncmov [#allocation4] }
 0x37f   :  { %s335_s19 = vpop.sfrf %334 }
 0x380   :  { %p355_p12 = scmp.ne.s32.totalorder %s335_s19, 0 }
 0x382   :  { %339 = shalt.err (%p355_p12)  }
 0x383   :  { %341 = vsyncmov [#allocation4 + $0x1] }
 0x386   :  { %s342_s20 = vpop.sfrf %341 }
 0x387   :  { %p356_p13 = scmp.ne.s32.totalorder %s342_s20, 0 }
 0x389   :  { %346 = shalt.err (%p356_p13)  }

</bundles_post_ra>
